<compile_context>
chip_gen: v6e
topology: v6e:2x2x1
jax: 0.10.0
libtpu: 0.0.40
codegen_flags: <defaults>
</compile_context>

<pallas_src>
import jax
import jax.numpy as jnp
from jax.experimental import pallas as pl
from jax.experimental.pallas import tpu as pltpu

HID1 = 768          # model1 hidden size (resize_linear input)
HID = 256           # resize_linear output / model2 hidden / BatchNorm1d features
ATTN = 36           # 12 layers x 3 rank features from attnCheck
COMB = HID + ATTN   # 292, LayerNorm normalized dim
BN_EPS = 1e-5
LN_EPS = 1e-5


def ensemble_head_kernel(h1_ref, h2_ref, attn_ref,
                         w_rs_ref, b_rs_ref,
                         bn_scale_ref, bn_shift_ref,
                         ln_g1_ref, ln_b1_ref, ln_g2_ref, ln_b2_ref,
                         w_cls1_ref, w_cls2_ref, b_cls_ref,
                         out_ref):
    f32 = jnp.float32

    # ---- branch 1: resize_linear (BatchNorm folded in) -> ReLU (dropout = id)
    #      h1 arrives f32; cast to bf16 on the VPU (free) right before the MXU
    #      matmul; accumulate in f32.
    z1 = jnp.dot(h1_ref[...].astype(jnp.bfloat16), w_rs_ref[...],
                 preferred_element_type=f32)
    z1 = jnp.maximum(z1 + b_rs_ref[...], 0.0)                      # (TB, 256)

    # ---- branch 2: BatchNorm1d(eval, shared params) -> ReLU (dropout = id)
    z2 = jnp.maximum(h2_ref[...] * bn_scale_ref[...]
                     + bn_shift_ref[...], 0.0)                     # (TB, 256)

    # ---- stack along dim=1 + mean == elementwise average; outer ReLU is a
    #      no-op since z1, z2 >= 0.
    avg = 0.5 * (z1 + z2)                                          # (TB, 256)

    # ---- attnCheck ranks: torch.pow(x, -1)
    inv_attn = 1.0 / attn_ref[...]                                 # (TB, 36)

    # ---- LayerNorm over concat([avg, inv_attn], dim=1) of width 292,
    #      computed on the two halves (no in-kernel lane concat), single-pass
    #      statistics: var = E[x^2] - mu^2.
    s = (jnp.sum(avg, axis=1, keepdims=True)
         + jnp.sum(inv_attn, axis=1, keepdims=True))               # (TB, 1)
    s2 = (jnp.sum(avg * avg, axis=1, keepdims=True)
          + jnp.sum(inv_attn * inv_attn, axis=1, keepdims=True))   # (TB, 1)
    mu = s * (1.0 / COMB)
    var = s2 * (1.0 / COMB) - mu * mu
    r = jax.lax.rsqrt(var + LN_EPS)                                # (TB, 1)

    # ---- affine LN + ReLU (dropout = id) -> classifier split over K = 256 + 36
    a1 = jnp.maximum((avg - mu) * r * ln_g1_ref[...] + ln_b1_ref[...], 0.0)
    a2 = jnp.maximum((inv_attn - mu) * r * ln_g2_ref[...] + ln_b2_ref[...], 0.0)

    logits = (jnp.dot(a1, w_cls1_ref[...], preferred_element_type=f32)
              + jnp.dot(a2, w_cls2_ref[...], preferred_element_type=f32)
              + b_cls_ref[...])                                    # (TB, NC)
    out_ref[...] = logits.astype(out_ref.dtype)


def _round_up(n, m):
    return ((n + m - 1) // m) * m


def _param_spec(shape):
    # constant index_map -> parameter stays VMEM-resident, fetched once
    return pl.BlockSpec(shape, lambda i: (0, 0))


def ensemble_head(h1, h2, attn_rank, params, *, tb_max=1024):
    B = h1.shape[0]
    num_classes = params["w_cls"].shape[1]

    # ---- fold eval-mode BatchNorm into the resize linear (done once, host side)
    scale = params["bn_g"] / jnp.sqrt(params["bn_v"] + BN_EPS)     # (256,)
    shift = params["bn_b"] - params["bn_m"] * scale
    w_rs = (params["w_rs"] * scale[None, :]).astype(jnp.bfloat16)  # (768, 256) bf16
    b_rs = (params["b_rs"] * scale + shift).reshape(1, HID)

    row = lambda v: v.reshape(1, -1)

    # ---- batch tiling: ragged grid (no host-side padding of activations).
    #      >= 2 tiles whenever B allows it so v7x megacore engages; tiles are
    #      balanced so the tail block is never mostly out-of-range rows.
    num_tiles = max(2, pl.cdiv(B, tb_max))
    tb = max(8, _round_up(pl.cdiv(B, num_tiles), 8))
    grid = (pl.cdiv(B, tb),)

    param_inputs = [
        w_rs, b_rs, row(scale), row(shift),
        row(params["ln_g"][:HID]), row(params["ln_b"][:HID]),
        row(params["ln_g"][HID:]), row(params["ln_b"][HID:]),
        params["w_cls"][:HID, :], params["w_cls"][HID:, :],
        row(params["b_cls"]),
    ]
    in_specs = [
        pl.BlockSpec((tb, HID1), lambda i: (i, 0)),
        pl.BlockSpec((tb, HID), lambda i: (i, 0)),
        pl.BlockSpec((tb, ATTN), lambda i: (i, 0)),
    ] + [_param_spec(x.shape) for x in param_inputs]
    # narrow output block: last dim == full array dim (num_classes), masked vst
    out_spec = pl.BlockSpec((tb, num_classes), lambda i: (i, 0))

    param_bytes = sum(int(x.size) * x.dtype.itemsize for x in param_inputs)
    cost = pl.CostEstimate(
        flops=2 * B * (HID1 * HID + COMB * num_classes),
        transcendentals=B * (ATTN + 1),
        bytes_accessed=(int(h1.size) * h1.dtype.itemsize
                        + int(h2.size) * h2.dtype.itemsize
                        + int(attn_rank.size) * attn_rank.dtype.itemsize
                        + param_bytes + B * num_classes * 4),
    )

    out = pl.pallas_call(
        ensemble_head_kernel,
        out_shape=jax.ShapeDtypeStruct((B, num_classes), jnp.float32),
        grid=grid,
        in_specs=in_specs,
        out_specs=out_spec,
        compiler_params=pltpu.CompilerParams(
            dimension_semantics=("parallel",),
            vmem_limit_bytes=48 * 1024 * 1024),
        cost_estimate=cost,
    )(h1, h2, attn_rank, *param_inputs)
    return out


def reference(h1, h2, attn_rank, p):
    """Pure-JAX reference of the same eval-mode forward (bf16 first matmul to
    match the kernel's MXU path; everything else f32)."""
    scale = p["bn_g"] / jnp.sqrt(p["bn_v"] + BN_EPS)
    shift = p["bn_b"] - p["bn_m"] * scale
    w_rs = (p["w_rs"] * scale[None, :]).astype(jnp.bfloat16)
    b_rs = p["b_rs"] * scale + shift
    z1 = jax.nn.relu(jnp.dot(h1.astype(jnp.bfloat16), w_rs,
                             preferred_element_type=jnp.float32) + b_rs)
    z2 = jax.nn.relu(h2 * scale + shift)
    avg = jax.nn.relu(jnp.mean(jnp.stack([z1, z2], axis=1), axis=1))
    comb = jnp.concatenate([avg, 1.0 / attn_rank], axis=1)
    mu = comb.mean(axis=1, keepdims=True)
    var = ((comb - mu) ** 2).mean(axis=1, keepdims=True)
    normed = (comb - mu) / jnp.sqrt(var + LN_EPS) * p["ln_g"] + p["ln_b"]
    return jax.nn.relu(normed) @ p["w_cls"] + p["b_cls"]


def init_params(key, num_classes):
    ks = jax.random.split(key, 10)
    f32 = jnp.float32
    return dict(
        w_rs=jax.random.normal(ks[0], (HID1, HID), f32) / jnp.sqrt(HID1),
        b_rs=0.01 * jax.random.normal(ks[1], (HID,), f32),
        bn_g=1.0 + 0.1 * jax.random.normal(ks[2], (HID,), f32),
        bn_b=0.1 * jax.random.normal(ks[3], (HID,), f32),
        bn_m=0.1 * jax.random.normal(ks[4], (HID,), f32),
        bn_v=jax.random.uniform(ks[5], (HID,), f32, 0.5, 1.5),
        ln_g=1.0 + 0.1 * jax.random.normal(ks[6], (COMB,), f32),
        ln_b=0.1 * jax.random.normal(ks[7], (COMB,), f32),
        w_cls=jax.random.normal(ks[8], (COMB, num_classes), f32) / jnp.sqrt(COMB),
        b_cls=0.01 * jax.random.normal(ks[9], (num_classes,), f32),
    )


if __name__ == "__main__":
    key = jax.random.PRNGKey(0)
    k_h1, k_h2, k_attn, k_par = jax.random.split(key, 4)

    B, num_classes = 8, 4
    # synthesized sub-module outputs (see TODO(synk) above)
    h1 = jax.random.normal(k_h1, (B, HID1), jnp.float32)          # model1 CLS hidden
    h2 = jax.random.normal(k_h2, (B, HID), jnp.float32)           # model2 CLS hidden
    attn_rank = jax.random.uniform(k_attn, (B, ATTN), jnp.float32,
                                   minval=1.0, maxval=2.0)        # 12 x attnCheck outputs

    params = init_params(k_par, num_classes)

    out = ensemble_head(h1, h2, attn_rank, params)
    out = jax.block_until_ready(out)

    ref = reference(h1, h2, attn_rank, params)
    assert out.shape == (B, num_classes)
    assert jnp.allclose(out, ref, atol=1e-3, rtol=1e-3), (out, ref)
    print("KERNEL_OK")
</pallas_src>

<mosaic_0001>
module attributes {stable_mosaic.version = 11 : i64} {
  func.func @ensemble_head_kernel(%arg0: i32, %arg1: memref<8x768xf32, #tpu.memory_space<vmem>>, %arg2: memref<8x256xf32, #tpu.memory_space<vmem>>, %arg3: memref<8x36xf32, #tpu.memory_space<vmem>>, %arg4: memref<768x256xbf16, #tpu.memory_space<vmem>>, %arg5: memref<1x256xf32, #tpu.memory_space<vmem>>, %arg6: memref<1x256xf32, #tpu.memory_space<vmem>>, %arg7: memref<1x256xf32, #tpu.memory_space<vmem>>, %arg8: memref<1x256xf32, #tpu.memory_space<vmem>>, %arg9: memref<1x256xf32, #tpu.memory_space<vmem>>, %arg10: memref<1x36xf32, #tpu.memory_space<vmem>>, %arg11: memref<1x36xf32, #tpu.memory_space<vmem>>, %arg12: memref<256x4xf32, #tpu.memory_space<vmem>>, %arg13: memref<36x4xf32, #tpu.memory_space<vmem>>, %arg14: memref<1x4xf32, #tpu.memory_space<vmem>>, %arg15: memref<8x4xf32, #tpu.memory_space<vmem>>) attributes {dimension_semantics = [#tpu.dimension_semantics<parallel>], iteration_bounds = array<i64: 1>, scalar_prefetch = 0 : i64, scratch_operands = 0 : i64, tpu.core_type = #tpu.core_type<tc>, window_params = [{transform_indices = @transform_0, window_bounds = array<i64: 8, 768>}, {transform_indices = @transform_1, window_bounds = array<i64: 8, 256>}, {transform_indices = @transform_2, window_bounds = array<i64: 8, 36>}, {pipeline_mode = #tpu.pipeline_mode<synchronous>, transform_indices = @transform_3, window_bounds = array<i64: 768, 256>}, {pipeline_mode = #tpu.pipeline_mode<synchronous>, transform_indices = @transform_4, window_bounds = array<i64: 1, 256>}, {pipeline_mode = #tpu.pipeline_mode<synchronous>, transform_indices = @transform_5, window_bounds = array<i64: 1, 256>}, {pipeline_mode = #tpu.pipeline_mode<synchronous>, transform_indices = @transform_6, window_bounds = array<i64: 1, 256>}, {pipeline_mode = #tpu.pipeline_mode<synchronous>, transform_indices = @transform_7, window_bounds = array<i64: 1, 256>}, {pipeline_mode = #tpu.pipeline_mode<synchronous>, transform_indices = @transform_8, window_bounds = array<i64: 1, 256>}, {pipeline_mode = #tpu.pipeline_mode<synchronous>, transform_indices = @transform_9, window_bounds = array<i64: 1, 36>}, {pipeline_mode = #tpu.pipeline_mode<synchronous>, transform_indices = @transform_10, window_bounds = array<i64: 1, 36>}, {pipeline_mode = #tpu.pipeline_mode<synchronous>, transform_indices = @transform_11, window_bounds = array<i64: 256, 4>}, {pipeline_mode = #tpu.pipeline_mode<synchronous>, transform_indices = @transform_12, window_bounds = array<i64: 36, 4>}, {pipeline_mode = #tpu.pipeline_mode<synchronous>, transform_indices = @transform_13, window_bounds = array<i64: 1, 4>}, {transform_indices = @transform_14, window_bounds = array<i64: 8, 4>}]} {
    %c0 = arith.constant 0 : index
    %c0_0 = arith.constant 0 : index
    %0 = vector.load %arg1[%c0, %c0_0] : memref<8x768xf32, #tpu.memory_space<vmem>>, vector<8x768xf32>
    %1 = arith.truncf %0 : vector<8x768xf32> to vector<8x768xbf16>
    %c0_1 = arith.constant 0 : index
    %c0_2 = arith.constant 0 : index
    %2 = vector.load %arg4[%c0_1, %c0_2] : memref<768x256xbf16, #tpu.memory_space<vmem>>, vector<768x256xbf16>
    %cst = arith.constant dense<0.000000e+00> : vector<8x256xf32>
    %3 = tpu.matmul %1, %2, %cst {dimension_numbers = #tpu.dot_dimension_numbers<[1], [0], [0], [1], [0, 0, 1, 1], [], []>} : vector<8x768xbf16>, vector<768x256xbf16>, vector<8x256xf32> -> vector<8x256xf32>
    %c0_3 = arith.constant 0 : index
    %c0_4 = arith.constant 0 : index
    %4 = vector.load %arg5[%c0_3, %c0_4] : memref<1x256xf32, #tpu.memory_space<vmem>>, vector<1x256xf32>
    %5 = vector.broadcast %4 : vector<1x256xf32> to vector<8x256xf32>
    %6 = arith.addf %3, %5 : vector<8x256xf32>
    %cst_5 = arith.constant 0.000000e+00 : f32
    %7 = vector.broadcast %cst_5 : f32 to vector<8x256xf32>
    %8 = arith.maximumf %6, %7 : vector<8x256xf32>
    %c0_6 = arith.constant 0 : index
    %c0_7 = arith.constant 0 : index
    %9 = vector.load %arg2[%c0_6, %c0_7] : memref<8x256xf32, #tpu.memory_space<vmem>>, vector<8x256xf32>
    %c0_8 = arith.constant 0 : index
    %c0_9 = arith.constant 0 : index
    %10 = vector.load %arg6[%c0_8, %c0_9] : memref<1x256xf32, #tpu.memory_space<vmem>>, vector<1x256xf32>
    %11 = vector.broadcast %10 : vector<1x256xf32> to vector<8x256xf32>
    %12 = arith.mulf %9, %11 : vector<8x256xf32>
    %c0_10 = arith.constant 0 : index
    %c0_11 = arith.constant 0 : index
    %13 = vector.load %arg7[%c0_10, %c0_11] : memref<1x256xf32, #tpu.memory_space<vmem>>, vector<1x256xf32>
    %14 = vector.broadcast %13 : vector<1x256xf32> to vector<8x256xf32>
    %15 = arith.addf %12, %14 : vector<8x256xf32>
    %cst_12 = arith.constant 0.000000e+00 : f32
    %16 = vector.broadcast %cst_12 : f32 to vector<8x256xf32>
    %17 = arith.maximumf %15, %16 : vector<8x256xf32>
    %18 = arith.addf %8, %17 : vector<8x256xf32>
    %cst_13 = arith.constant 5.000000e-01 : f32
    %19 = vector.broadcast %cst_13 : f32 to vector<8x256xf32>
    %20 = arith.mulf %19, %18 : vector<8x256xf32>
    %c0_14 = arith.constant 0 : index
    %c0_15 = arith.constant 0 : index
    %21 = vector.load %arg3[%c0_14, %c0_15] : memref<8x36xf32, #tpu.memory_space<vmem>>, vector<8x36xf32>
    %cst_16 = arith.constant 1.000000e+00 : f32
    %22 = vector.broadcast %cst_16 : f32 to vector<8x36xf32>
    %23 = arith.divf %22, %21 : vector<8x36xf32>
    %cst_17 = arith.constant dense<0.000000e+00> : vector<8xf32>
    %24 = vector.multi_reduction <add>, %20, %cst_17 [1] : vector<8x256xf32> to vector<8xf32>
    %25 = vector.shape_cast %24 : vector<8xf32> to vector<8x1xf32>
    %cst_18 = arith.constant dense<0.000000e+00> : vector<8xf32>
    %26 = vector.multi_reduction <add>, %23, %cst_18 [1] : vector<8x36xf32> to vector<8xf32>
    %27 = vector.shape_cast %26 : vector<8xf32> to vector<8x1xf32>
    %28 = arith.addf %25, %27 : vector<8x1xf32>
    %29 = arith.mulf %20, %20 : vector<8x256xf32>
    %cst_19 = arith.constant dense<0.000000e+00> : vector<8xf32>
    %30 = vector.multi_reduction <add>, %29, %cst_19 [1] : vector<8x256xf32> to vector<8xf32>
    %31 = vector.shape_cast %30 : vector<8xf32> to vector<8x1xf32>
    %32 = arith.mulf %23, %23 : vector<8x36xf32>
    %cst_20 = arith.constant dense<0.000000e+00> : vector<8xf32>
    %33 = vector.multi_reduction <add>, %32, %cst_20 [1] : vector<8x36xf32> to vector<8xf32>
    %34 = vector.shape_cast %33 : vector<8xf32> to vector<8x1xf32>
    %35 = arith.addf %31, %34 : vector<8x1xf32>
    %cst_21 = arith.constant 0.00342465751 : f32
    %36 = vector.broadcast %cst_21 : f32 to vector<8x1xf32>
    %37 = arith.mulf %28, %36 : vector<8x1xf32>
    %cst_22 = arith.constant 0.00342465751 : f32
    %38 = vector.broadcast %cst_22 : f32 to vector<8x1xf32>
    %39 = arith.mulf %35, %38 : vector<8x1xf32>
    %40 = arith.mulf %37, %37 : vector<8x1xf32>
    %41 = arith.subf %39, %40 : vector<8x1xf32>
    %cst_23 = arith.constant 9.99999974E-6 : f32
    %42 = vector.broadcast %cst_23 : f32 to vector<8x1xf32>
    %43 = arith.addf %41, %42 : vector<8x1xf32>
    %44 = math.rsqrt %43 : vector<8x1xf32>
    %45 = vector.broadcast %37 : vector<8x1xf32> to vector<8x256xf32>
    %46 = arith.subf %20, %45 : vector<8x256xf32>
    %47 = vector.broadcast %44 : vector<8x1xf32> to vector<8x256xf32>
    %48 = arith.mulf %46, %47 : vector<8x256xf32>
    %c0_24 = arith.constant 0 : index
    %c0_25 = arith.constant 0 : index
    %49 = vector.load %arg8[%c0_24, %c0_25] : memref<1x256xf32, #tpu.memory_space<vmem>>, vector<1x256xf32>
    %50 = vector.broadcast %49 : vector<1x256xf32> to vector<8x256xf32>
    %51 = arith.mulf %48, %50 : vector<8x256xf32>
    %c0_26 = arith.constant 0 : index
    %c0_27 = arith.constant 0 : index
    %52 = vector.load %arg9[%c0_26, %c0_27] : memref<1x256xf32, #tpu.memory_space<vmem>>, vector<1x256xf32>
    %53 = vector.broadcast %52 : vector<1x256xf32> to vector<8x256xf32>
    %54 = arith.addf %51, %53 : vector<8x256xf32>
    %cst_28 = arith.constant 0.000000e+00 : f32
    %55 = vector.broadcast %cst_28 : f32 to vector<8x256xf32>
    %56 = arith.maximumf %54, %55 : vector<8x256xf32>
    %57 = vector.broadcast %37 : vector<8x1xf32> to vector<8x36xf32>
    %58 = arith.subf %23, %57 : vector<8x36xf32>
    %59 = vector.broadcast %44 : vector<8x1xf32> to vector<8x36xf32>
    %60 = arith.mulf %58, %59 : vector<8x36xf32>
    %c0_29 = arith.constant 0 : index
    %c0_30 = arith.constant 0 : index
    %61 = vector.load %arg10[%c0_29, %c0_30] : memref<1x36xf32, #tpu.memory_space<vmem>>, vector<1x36xf32>
    %62 = vector.broadcast %61 : vector<1x36xf32> to vector<8x36xf32>
    %63 = arith.mulf %60, %62 : vector<8x36xf32>
    %c0_31 = arith.constant 0 : index
    %c0_32 = arith.constant 0 : index
    %64 = vector.load %arg11[%c0_31, %c0_32] : memref<1x36xf32, #tpu.memory_space<vmem>>, vector<1x36xf32>
    %65 = vector.broadcast %64 : vector<1x36xf32> to vector<8x36xf32>
    %66 = arith.addf %63, %65 : vector<8x36xf32>
    %cst_33 = arith.constant 0.000000e+00 : f32
    %67 = vector.broadcast %cst_33 : f32 to vector<8x36xf32>
    %68 = arith.maximumf %66, %67 : vector<8x36xf32>
    %c0_34 = arith.constant 0 : index
    %c0_35 = arith.constant 0 : index
    %69 = vector.load %arg12[%c0_34, %c0_35] : memref<256x4xf32, #tpu.memory_space<vmem>>, vector<256x4xf32>
    %cst_36 = arith.constant dense<0.000000e+00> : vector<8x4xf32>
    %70 = tpu.matmul %56, %69, %cst_36 {dimension_numbers = #tpu.dot_dimension_numbers<[1], [0], [0], [1], [0, 0, 1, 1], [], []>} : vector<8x256xf32>, vector<256x4xf32>, vector<8x4xf32> -> vector<8x4xf32>
    %c0_37 = arith.constant 0 : index
    %c0_38 = arith.constant 0 : index
    %71 = vector.load %arg13[%c0_37, %c0_38] : memref<36x4xf32, #tpu.memory_space<vmem>>, vector<36x4xf32>
    %cst_39 = arith.constant dense<0.000000e+00> : vector<8x4xf32>
    %72 = tpu.matmul %68, %71, %cst_39 {dimension_numbers = #tpu.dot_dimension_numbers<[1], [0], [0], [1], [0, 0, 1, 1], [], []>} : vector<8x36xf32>, vector<36x4xf32>, vector<8x4xf32> -> vector<8x4xf32>
    %73 = arith.addf %70, %72 : vector<8x4xf32>
    %c0_40 = arith.constant 0 : index
    %c0_41 = arith.constant 0 : index
    %74 = vector.load %arg14[%c0_40, %c0_41] : memref<1x4xf32, #tpu.memory_space<vmem>>, vector<1x4xf32>
    %75 = vector.broadcast %74 : vector<1x4xf32> to vector<8x4xf32>
    %76 = arith.addf %73, %75 : vector<8x4xf32>
    %c0_42 = arith.constant 0 : index
    %c0_43 = arith.constant 0 : index
    %77 = vector.load %arg15[%c0_42, %c0_43] : memref<8x4xf32, #tpu.memory_space<vmem>>, vector<8x4xf32>
    tpu.vector_store %arg15[%c0_42, %c0_43], %76 {strides = array<i32>} : memref<8x4xf32, #tpu.memory_space<vmem>>, vector<8x4xf32>,
    return
  }
  func.func @transform_0(%arg0: i32) -> (i32, i32) {
    %c0_i32 = arith.constant 0 : i32
    %c0_i32_0 = arith.constant 0 : i32
    return %arg0, %c0_i32 : i32, i32
  }
  func.func @transform_1(%arg0: i32) -> (i32, i32) {
    %c0_i32 = arith.constant 0 : i32
    %c0_i32_0 = arith.constant 0 : i32
    return %arg0, %c0_i32 : i32, i32
  }
  func.func @transform_2(%arg0: i32) -> (i32, i32) {
    %c0_i32 = arith.constant 0 : i32
    %c0_i32_0 = arith.constant 0 : i32
    return %arg0, %c0_i32 : i32, i32
  }
  func.func @transform_3(%arg0: i32) -> (i32, i32) {
    %c0_i32 = arith.constant 0 : i32
    %c0_i32_0 = arith.constant 0 : i32
    %c0_i32_1 = arith.constant 0 : i32
    return %c0_i32, %c0_i32_0 : i32, i32
  }
  func.func @transform_4(%arg0: i32) -> (i32, i32) {
    %c0_i32 = arith.constant 0 : i32
    %c0_i32_0 = arith.constant 0 : i32
    %c0_i32_1 = arith.constant 0 : i32
    return %c0_i32, %c0_i32_0 : i32, i32
  }
  func.func @transform_5(%arg0: i32) -> (i32, i32) {
    %c0_i32 = arith.constant 0 : i32
    %c0_i32_0 = arith.constant 0 : i32
    %c0_i32_1 = arith.constant 0 : i32
    return %c0_i32, %c0_i32_0 : i32, i32
  }
  func.func @transform_6(%arg0: i32) -> (i32, i32) {
    %c0_i32 = arith.constant 0 : i32
    %c0_i32_0 = arith.constant 0 : i32
    %c0_i32_1 = arith.constant 0 : i32
    return %c0_i32, %c0_i32_0 : i32, i32
  }
  func.func @transform_7(%arg0: i32) -> (i32, i32) {
    %c0_i32 = arith.constant 0 : i32
    %c0_i32_0 = arith.constant 0 : i32
    %c0_i32_1 = arith.constant 0 : i32
    return %c0_i32, %c0_i32_0 : i32, i32
  }
  func.func @transform_8(%arg0: i32) -> (i32, i32) {
    %c0_i32 = arith.constant 0 : i32
    %c0_i32_0 = arith.constant 0 : i32
    %c0_i32_1 = arith.constant 0 : i32
    return %c0_i32, %c0_i32_0 : i32, i32
  }
  func.func @transform_9(%arg0: i32) -> (i32, i32) {
    %c0_i32 = arith.constant 0 : i32
    %c0_i32_0 = arith.constant 0 : i32
    %c0_i32_1 = arith.constant 0 : i32
    return %c0_i32, %c0_i32_0 : i32, i32
  }
  func.func @transform_10(%arg0: i32) -> (i32, i32) {
    %c0_i32 = arith.constant 0 : i32
    %c0_i32_0 = arith.constant 0 : i32
    %c0_i32_1 = arith.constant 0 : i32
    return %c0_i32, %c0_i32_0 : i32, i32
  }
  func.func @transform_11(%arg0: i32) -> (i32, i32) {
    %c0_i32 = arith.constant 0 : i32
    %c0_i32_0 = arith.constant 0 : i32
    %c0_i32_1 = arith.constant 0 : i32
    return %c0_i32, %c0_i32_0 : i32, i32
  }
  func.func @transform_12(%arg0: i32) -> (i32, i32) {
    %c0_i32 = arith.constant 0 : i32
    %c0_i32_0 = arith.constant 0 : i32
    %c0_i32_1 = arith.constant 0 : i32
    return %c0_i32, %c0_i32_0 : i32, i32
  }
  func.func @transform_13(%arg0: i32) -> (i32, i32) {
    %c0_i32 = arith.constant 0 : i32
    %c0_i32_0 = arith.constant 0 : i32
    %c0_i32_1 = arith.constant 0 : i32
    return %c0_i32, %c0_i32_0 : i32, i32
  }
  func.func @transform_14(%arg0: i32) -> (i32, i32) {
    %c0_i32 = arith.constant 0 : i32
    %c0_i32_0 = arith.constant 0 : i32
    return %arg0, %c0_i32 : i32, i32
  }
}

</mosaic_0001>

<bundles_post_ra>
// kernel: tpu_custom_call.1
= control target key start
LH: loop header
LB: loop body
LE: loop exit
PB: predicated region body
PF: predicated region fallthrough
CT: control target
= control target key end

     0   :  { %19 = vsyncpa [#allocation3], 0  ;;  %s1431_s29 = smov [#allocation2]   ;;  %s1717_s0 = inlined_call_operand.vmem [shape: f32[8,768], index: 0, kind: input, shape index: {}]   ;;  %s1718_s1 = inlined_call_operand.vmem [shape: f32[8,256], index: 1, kind: input, shape index: {}]   ;;  %s1719_s2 = inlined_call_operand.vmem [shape: f32[8,36], index: 2, kind: input, shape index: {}]   ;;  %s1720_s3 = inlined_call_operand.hbm [shape: bf16[768,256], index: 3, kind: input, shape index: {}]   ;;  %s1721_s4 = inlined_call_operand.vmem [shape: f32[1,256], index: 4, kind: input, shape index: {}]   ;;  %s1722_s5 = inlined_call_operand.vmem [shape: f32[1,256], index: 5, kind: input, shape index: {}]   ;;  %s1723_s6 = inlined_call_operand.vmem [shape: f32[1,256], index: 6, kind: input, shape index: {}]   ;;  %s1724_s7 = inlined_call_operand.vmem [shape: f32[1,256], index: 7, kind: input, shape index: {}]   ;;  %s1725_s8 = inlined_call_operand.vmem [shape: f32[1,256], index: 8, kind: input, shape index: {}]   ;;  %s1726_s9 = inlined_call_operand.vmem [shape: f32[1,36], index: 9, kind: input, shape index: {}]   ;;  %s1727_s10 = inlined_call_operand.vmem [shape: f32[1,36], index: 10, kind: input, shape index: {}]   ;;  %s1728_s11 = inlined_call_operand.vmem [shape: f32[256,4], index: 11, kind: input, shape index: {}]   ;;  %s1729_s12 = inlined_call_operand.vmem [shape: f32[36,4], index: 12, kind: input, shape index: {}]   ;;  %s1730_s13 = inlined_call_operand.vmem [shape: f32[1,4], index: 13, kind: input, shape index: {}]   ;;  %s1731_s14 = inlined_call_operand.vmem [shape: f32[8,4], index: 14, kind: output, shape index: {}]  }
   0x1   :  { %s31_s30 = sshll.u32 %s1431_s29, 4  ;;  %s32_s30 = int_to_ptr.vmem [resolvable:$true] %s31_s30 }
   0x2   :  { %s1417_s15 = scalar_lea.vmem %s32_s30, 12288  ;;  %p1422_p1 = scmp.lt.s32.totalorder %s32_s30, %s32_s30 }
   0x3   :  { %p1418_p0 = scmp.ne.s32.totalorder %s32_s30, %s1417_s15  ;;  %p1423_p2 = scmp.lt.s32.totalorder %s1417_s15, %s1417_s15 }
   0x5   :  { %p1424_p3 = por %p1423_p2, %p1422_p1 }
   0x7   :  { %p1425_p4 = pnand %p1424_p3, %p1418_p0 }
   0x9   :  { %1428 = shalt.err (!%p1425_p4)
}
   0xa   :  { %s1432_s16 = smov 128   ;;  %s1433_s17 = smov 8  }
   0xb   :  { %37 = dma.hbm_to_vmem [thread:$0]  %s1720_s3, 12288, %s32_s30, [#allocation3], %s1432_s16, %s1432_s16, %s1433_s17  }
   0xc   :  { %1429 = dma.done.wait [#allocation3], 12288  }
   0xd   :  { %1430 = vsyncadd [#allocation3], 4294955008  ;;  %v1261_v0 = vld [vmem:[#allocation2 + $0x74] ss:$8 sps:$4 sm:$0xff]   ;;  %v1263_v1 = vld [vmem:[#allocation2 + $0x70] ss:$8 sps:$4 sm:$0xff]  }
   0xe   :  { %661 = vmatprep.subr.bf16.mxu0 %v1261_v0  ;;  %v1264_v2 = vld [vmem:[#allocation2 + $0x174] ss:$8 sps:$4 sm:$0xff]   ;;  %v1266_v3 = vld [vmem:[#allocation2 + $0x170] ss:$8 sps:$4 sm:$0xff]   ;;  %v1267_v4 = vld [vmem:[#allocation2 + $0x64] ss:$8 sps:$4 sm:$0xff]  }
   0xf   :  { %662 = vmatpush1.bf16.msra.mxu0 %v1263_v1  ;;  %v1269_v5 = vld [vmem:[#allocation2 + $0x60] ss:$8 sps:$4 sm:$0xff]   ;;  %702 = vmatprep.subr.bf16.mxu1 %v1264_v2  ;;  %v1270_v6 = vld [vmem:[#allocation2 + $0x164] ss:$8 sps:$4 sm:$0xff]   ;;  %v1273_v8 = vld [vmem:[#allocation2 + $0x54] ss:$8 sps:$4 sm:$0xff]  }
  0x10   :  { %703 = vmatpush1.bf16.msra.mxu1 %v1266_v3  ;;  %663 = vmatprep.subr.bf16.mxu0 %v1267_v4  ;;  %v1272_v7 = vld [vmem:[#allocation2 + $0x160] ss:$8 sps:$4 sm:$0xff]   ;;  %v1275_v9 = vld [vmem:[#allocation2 + $0x50] ss:$8 sps:$4 sm:$0xff]   ;;  %v1276_v10 = vld [vmem:[#allocation2 + $0x154] ss:$8 sps:$4 sm:$0xff]  }
  0x11   :  { %704 = vmatprep.subr.bf16.mxu1 %v1270_v6  ;;  %v1279_v11 = vld [vmem:[#allocation2 + $0x44] ss:$8 sps:$4 sm:$0xff]   ;;  %v1278_v12 = vld [vmem:[#allocation2 + $0x150] ss:$8 sps:$4 sm:$0xff]   ;;  %v1281_v14 = vld [vmem:[#allocation2 + $0x40] ss:$8 sps:$4 sm:$0xff]  }
  0x12   :  { %v1282_v13 = vld [vmem:[#allocation2 + $0x144] ss:$8 sps:$4 sm:$0xff]   ;;  %v1285_v15 = vld [vmem:[#allocation2 + $0x34] ss:$8 sps:$4 sm:$0xff]   ;;  %v1284_v16 = vld [vmem:[#allocation2 + $0x140] ss:$8 sps:$4 sm:$0xff]  }
  0x13   :  { %664 = vmatpush1.bf16.msra.mxu0 %v1269_v5  ;;  %v1288_v17 = vld [vmem:[#allocation2 + $0x134] ss:$8 sps:$4 sm:$0xff]   ;;  %v1287_v18 = vld [vmem:[#allocation2 + $0x30] ss:$8 sps:$4 sm:$0xff]   ;;  %v1291_v19 = vld [vmem:[#allocation2 + $0x24] ss:$8 sps:$4 sm:$0xff]  }
  0x14   :  { %665 = vmatprep.subr.bf16.mxu0 %v1273_v8  ;;  %705 = vmatpush1.bf16.msra.mxu1 %v1272_v7  ;;  %v1290_v20 = vld [vmem:[#allocation2 + $0x130] ss:$8 sps:$4 sm:$0xff]   ;;  %v1294_v21 = vld [vmem:[#allocation2 + $0x124] ss:$8 sps:$4 sm:$0xff]   ;;  %v1293_v22 = vld [vmem:[#allocation2 + $0x20] ss:$8 sps:$4 sm:$0xff]  }
  0x15   :  { %706 = vmatprep.subr.bf16.mxu1 %v1276_v10  ;;  %v1297_v23 = vld [vmem:[#allocation2 + $0x14] ss:$8 sps:$4 sm:$0xff]   ;;  %v1296_v24 = vld [vmem:[#allocation2 + $0x120] ss:$8 sps:$4 sm:$0xff]   ;;  %v1299_v26 = vld [vmem:[#allocation2 + $0x10] ss:$8 sps:$4 sm:$0xff]  }
  0x16   :  { %v1300_v25 = vld [vmem:[#allocation2 + $0x114] ss:$8 sps:$4 sm:$0xff]   ;;  %v1303_v27 = vld [vmem:[#allocation2 + $0x4] ss:$8 sps:$4 sm:$0xff]   ;;  %v1302_v28 = vld [vmem:[#allocation2 + $0x110] ss:$8 sps:$4 sm:$0xff]  }
  0x17   :  { %666 = vmatpush1.bf16.msra.mxu0 %v1275_v9  ;;  %v1306_v29 = vld [vmem:[#allocation2 + $0x104] ss:$8 sps:$4 sm:$0xff]   ;;  %v1305_v30 = vld [vmem:[#allocation2] ss:$8 sps:$4 sm:$0xff]   ;;  %v1309_v31 = vld [vmem:[#allocation2 + $0xf4] ss:$8 sps:$4 sm:$0xff]  }
  0x18   :  { %667 = vmatprep.subr.bf16.mxu0 %v1279_v11  ;;  %707 = vmatpush1.bf16.msra.mxu1 %v1278_v12  ;;  %v1308_v32 = vld [vmem:[#allocation2 + $0x100] ss:$8 sps:$4 sm:$0xff]   ;;  %v1312_v33 = vld [vmem:[#allocation2 + $0x1f4] ss:$8 sps:$4 sm:$0xff]   ;;  %v1311_v34 = vld [vmem:[#allocation2 + $0xf0] ss:$8 sps:$4 sm:$0xff]  }
  0x19   :  { %708 = vmatprep.subr.bf16.mxu1 %v1282_v13  ;;  %v1315_v35 = vld [vmem:[#allocation2 + $0xe4] ss:$8 sps:$4 sm:$0xff]   ;;  %v1314_v36 = vld [vmem:[#allocation2 + $0x1f0] ss:$8 sps:$4 sm:$0xff]   ;;  %v1317_v38 = vld [vmem:[#allocation2 + $0xe0] ss:$8 sps:$4 sm:$0xff]  }
  0x1a   :  { %v1318_v37 = vld [vmem:[#allocation2 + $0x1e4] ss:$8 sps:$4 sm:$0xff]   ;;  %v1321_v39 = vld [vmem:[#allocation2 + $0xd4] ss:$8 sps:$4 sm:$0xff]   ;;  %v1320_v40 = vld [vmem:[#allocation2 + $0x1e0] ss:$8 sps:$4 sm:$0xff]  }
  0x1b   :  { %668 = vmatpush1.bf16.msra.mxu0 %v1281_v14  ;;  %v1324_v41 = vld [vmem:[#allocation2 + $0x1d4] ss:$8 sps:$4 sm:$0xff]   ;;  %v1323_v42 = vld [vmem:[#allocation2 + $0xd0] ss:$8 sps:$4 sm:$0xff]   ;;  %v1327_v43 = vld [vmem:[#allocation2 + $0xc4] ss:$8 sps:$4 sm:$0xff]  }
  0x1c   :  { %669 = vmatprep.subr.bf16.mxu0 %v1285_v15  ;;  %709 = vmatpush1.bf16.msra.mxu1 %v1284_v16  ;;  %v1326_v44 = vld [vmem:[#allocation2 + $0x1d0] ss:$8 sps:$4 sm:$0xff]   ;;  %v1330_v45 = vld [vmem:[#allocation2 + $0x1c4] ss:$8 sps:$4 sm:$0xff]   ;;  %v1329_v47 = vld [vmem:[#allocation2 + $0xc0] ss:$8 sps:$4 sm:$0xff]  }
  0x1d   :  { %710 = vmatprep.subr.bf16.mxu1 %v1288_v17  ;;  %v62_v46 = vld [vmem:[%s1717_s0 + $0x8] sm:$0xff]  ;;  %v1333_v49 = vld [vmem:[#allocation2 + $0xb4] ss:$8 sps:$4 sm:$0xff]   ;;  %v1335_v54 = vld [vmem:[#allocation2 + $0xb0] ss:$8 sps:$4 sm:$0xff]   ;;  %vm828_vm0 = vcmask 293888  }
  0x1e   :  { %v68_v48 = vpack.c.bf16 %v62_v46, %v62_v46  ;;  %v64_v50 = vld [vmem:[%s1717_s0 + $0x18] sm:$0xff]  ;;  %v1332_v51 = vld [vmem:[#allocation2 + $0x1c0] ss:$8 sps:$4 sm:$0xff]   ;;  %v1339_v55 = vld [vmem:[#allocation2 + $0xa4] ss:$8 sps:$4 sm:$0xff]   ;;  %vm942_vm1 = vcmask 1043456  }
  0x1f   :  { %670 = vmatpush1.bf16.msra.mxu0 %v1287_v18  ;;  %v70_v52 = vpack.c.bf16 %v64_v50, %v64_v50  ;;  %v1336_v53 = vld [vmem:[#allocation2 + $0x1b4] ss:$8 sps:$4 sm:$0xff]   ;;  %v1338_v56 = vld [vmem:[#allocation2 + $0x1b0] ss:$8 sps:$4 sm:$0xff]   ;;  %v1342_v57 = vld [vmem:[#allocation2 + $0x1a4] ss:$8 sps:$4 sm:$0xff]  }
  0x20   :  { %671 = vmatprep.subr.bf16.mxu0 %v1291_v19  ;;  %711 = vmatpush1.bf16.msra.mxu1 %v1290_v20  ;;  %v1341_v58 = vld [vmem:[#allocation2 + $0xa0] ss:$8 sps:$4 sm:$0xff]   ;;  %v1345_v59 = vld [vmem:[#allocation2 + $0x94] ss:$8 sps:$4 sm:$0xff]   ;;  %v1347_v62 = vld [vmem:[#allocation2 + $0x90] ss:$8 sps:$4 sm:$0xff]  }
  0x21   :  { %712 = vmatprep.subr.bf16.mxu1 %v1294_v21  ;;  %693 = vmatprep.mubr.bf16.mxu0 %v68_v48  ;;  %v1344_v60 = vld [vmem:[#allocation2 + $0x1a0] ss:$8 sps:$4 sm:$0xff]   ;;  %v1348_v61 = vld [vmem:[#allocation2 + $0x194] ss:$8 sps:$4 sm:$0xff]   ;;  %v1351_v63 = vld [vmem:[#allocation2 + $0x84] ss:$8 sps:$4 sm:$0xff]  }
  0x22   :  { %734 = vmatprep.mubr.bf16.mxu1 %v70_v52  ;;  %v1350_v0 = vld [vmem:[#allocation2 + $0x190] ss:$8 sps:$4 sm:$0xff]   ;;  %v1353_v1 = vld [vmem:[#allocation2 + $0x80] ss:$8 sps:$4 sm:$0xff]   ;;  %v1354_v2 = vld [vmem:[#allocation2 + $0x184] ss:$8 sps:$4 sm:$0xff]   ;;  %v171_v52 = vlaneseq }
  0x23   :  { %672 = vmatpush1.bf16.msra.mxu0 %v1293_v22  ;;  %v1356_v3 = vld [vmem:[#allocation2 + $0x180] ss:$8 sps:$4 sm:$0xff]   ;;  %v1359_v5 = vld [vmem:[#allocation2 + $0x274] ss:$8 sps:$4 sm:$0xff]   ;;  %v1357_v8 = vld [vmem:[#allocation2 + $0x270] ss:$8 sps:$4 sm:$0xff]  }
  0x24   :  { %673 = vmatprep.subr.bf16.mxu0 %v1297_v23  ;;  %713 = vmatpush1.bf16.msra.mxu1 %v1296_v24  ;;  %v61_v4 = vld [vmem:[%s1717_s0] sm:$0xff]  ;;  %v63_v6 = vld [vmem:[%s1717_s0 + $0x10] sm:$0xff]  ;;  %v66_v11 = vld [vmem:[%s1717_s0 + $0x28] sm:$0xff]  ;;  %vm1435_vm2 = vmmov 0   ;;  %vm1094_vm3 = vcmask 31744  }
  0x25   :  { %714 = vmatprep.subr.bf16.mxu1 %v1300_v25  ;;  %v67_v7 = vpack.c.bf16 %v61_v4, %v61_v4  ;;  %v69_v9 = vpack.c.bf16 %v63_v6, %v63_v6  ;;  %v1362_v10 = vld [vmem:[#allocation2 + $0x264] ss:$8 sps:$4 sm:$0xff]   ;;  %v72_v12 = vpack.c.bf16 %v66_v11, %v66_v11  ;;  %v1360_v13 = vld [vmem:[#allocation2 + $0x260] ss:$8 sps:$4 sm:$0xff]   ;;  %v1365_v14 = vld [vmem:[#allocation2 + $0x254] ss:$8 sps:$4 sm:$0xff]  }
  0x26   :  { %v1363_v15 = vld [vmem:[#allocation2 + $0x250] ss:$8 sps:$4 sm:$0xff]   ;;  %v1368_v16 = vld [vmem:[#allocation2 + $0x244] ss:$8 sps:$4 sm:$0xff]   ;;  %v1366_v17 = vld [vmem:[#allocation2 + $0x240] ss:$8 sps:$4 sm:$0xff]  }
  0x27   :  { %674 = vmatpush1.bf16.msra.mxu0 %v1299_v26  ;;  %v1371_v18 = vld [vmem:[#allocation2 + $0x234] ss:$8 sps:$4 sm:$0xff]   ;;  %v1369_v19 = vld [vmem:[#allocation2 + $0x230] ss:$8 sps:$4 sm:$0xff]   ;;  %v1374_v20 = vld [vmem:[#allocation2 + $0x224] ss:$8 sps:$4 sm:$0xff]  }
  0x28   :  { %675 = vmatprep.subr.bf16.mxu0 %v1303_v27  ;;  %715 = vmatpush1.bf16.msra.mxu1 %v1302_v28  ;;  %v1372_v21 = vld [vmem:[#allocation2 + $0x220] ss:$8 sps:$4 sm:$0xff]   ;;  %v1377_v22 = vld [vmem:[#allocation2 + $0x214] ss:$8 sps:$4 sm:$0xff]   ;;  %v1375_v23 = vld [vmem:[#allocation2 + $0x210] ss:$8 sps:$4 sm:$0xff]  }
  0x29   :  { %716 = vmatprep.subr.bf16.mxu1 %v1306_v29  ;;  %v1380_v24 = vld [vmem:[#allocation2 + $0x204] ss:$8 sps:$4 sm:$0xff]   ;;  %v1378_v25 = vld [vmem:[#allocation2 + $0x200] ss:$8 sps:$4 sm:$0xff]   ;;  %v1383_v26 = vld [vmem:[#allocation2 + $0x2f4] ss:$8 sps:$4 sm:$0xff]  }
  0x2a   :  { %v1381_v27 = vld [vmem:[#allocation2 + $0x2f0] ss:$8 sps:$4 sm:$0xff]   ;;  %v1386_v28 = vld [vmem:[#allocation2 + $0x2e4] ss:$8 sps:$4 sm:$0xff]   ;;  %v1384_v29 = vld [vmem:[#allocation2 + $0x2e0] ss:$8 sps:$4 sm:$0xff]  }
  0x2b   :  { %676 = vmatpush1.bf16.msra.mxu0 %v1305_v30  ;;  %v1389_v30 = vld [vmem:[#allocation2 + $0x2d4] ss:$8 sps:$4 sm:$0xff]  }
  0x2c   :  { %677 = vmatprep.subr.bf16.mxu0 %v1309_v31  ;;  %717 = vmatpush1.bf16.msra.mxu1 %v1308_v32  ;;  %v1387_v31 = vld [vmem:[#allocation2 + $0x2d0] ss:$8 sps:$4 sm:$0xff]   ;;  %v1392_v32 = vld [vmem:[#allocation2 + $0x2c4] ss:$8 sps:$4 sm:$0xff]  }
  0x2d   :  { %718 = vmatprep.subr.bf16.mxu1 %v1312_v33  ;;  %v1390_v33 = vld [vmem:[#allocation2 + $0x2c0] ss:$8 sps:$4 sm:$0xff]  }
  0x2f   :  { %678 = vmatpush2.bf16.msra.mxu0 %v1311_v34  ;;  %v1395_v34 = vld [vmem:[#allocation2 + $0x2b4] ss:$8 sps:$4 sm:$0xff]  }
  0x30   :  { %679 = vmatprep.subr.bf16.mxu0 %v1315_v35  ;;  %719 = vmatpush2.bf16.msra.mxu1 %v1314_v36  ;;  %v1393_v35 = vld [vmem:[#allocation2 + $0x2b0] ss:$8 sps:$4 sm:$0xff]   ;;  %v1398_v36 = vld [vmem:[#allocation2 + $0x2a4] ss:$8 sps:$4 sm:$0xff]  }
  0x31   :  { %720 = vmatprep.subr.bf16.mxu1 %v1318_v37  ;;  %v1396_v37 = vld [vmem:[#allocation2 + $0x2a0] ss:$8 sps:$4 sm:$0xff]  }
  0x33   :  { %680 = vmatpush2.bf16.msra.mxu0 %v1317_v38  ;;  %v1401_v38 = vld [vmem:[#allocation2 + $0x294] ss:$8 sps:$4 sm:$0xff]  }
  0x34   :  { %681 = vmatprep.subr.bf16.mxu0 %v1321_v39  ;;  %721 = vmatpush2.bf16.msra.mxu1 %v1320_v40  ;;  %v1399_v39 = vld [vmem:[#allocation2 + $0x290] ss:$8 sps:$4 sm:$0xff]   ;;  %v1404_v40 = vld [vmem:[#allocation2 + $0x284] ss:$8 sps:$4 sm:$0xff]  }
  0x35   :  { %722 = vmatprep.subr.bf16.mxu1 %v1324_v41  ;;  %v1402_v41 = vld [vmem:[#allocation2 + $0x280] ss:$8 sps:$4 sm:$0xff]  }
  0x37   :  { %682 = vmatpush2.bf16.msra.mxu0 %v1323_v42  ;;  %v65_v42 = vld [vmem:[%s1717_s0 + $0x20] sm:$0xff] }
  0x38   :  { %683 = vmatprep.subr.bf16.mxu0 %v1327_v43  ;;  %723 = vmatpush2.bf16.msra.mxu1 %v1326_v44  ;;  %v71_v43 = vpack.c.bf16 %v65_v42, %v65_v42 }
  0x39   :  { %724 = vmatprep.subr.bf16.mxu1 %v1330_v45 }
  0x3b   :  { %684 = vmatpush2.bf16.msra.mxu0 %v1329_v47 }
  0x3c   :  { %685 = vmatprep.subr.bf16.mxu0 %v1333_v49  ;;  %725 = vmatpush2.bf16.msra.mxu1 %v1332_v51 }
  0x3d   :  { %726 = vmatprep.subr.bf16.mxu1 %v1336_v53  ;;  %v172_v53 = vshrl.u32 %v171_v52, 7  ;;  %v1592_v52 = vld [vmem:[%s1724_s7] sm:$0x3] }
  0x3f   :  { %686 = vmatpush2.bf16.msra.mxu0 %v1335_v54  ;;  %v788_v54 = vld [vmem:[%s1722_s5] sm:$0x3] }
  0x40   :  { %687 = vmatprep.subr.bf16.mxu0 %v1339_v55  ;;  %727 = vmatpush2.bf16.msra.mxu1 %v1338_v56  ;;  %v1535_v55 = vsub.s32 0, %v172_v53  ;;  %v169_v56 = vld [vmem:[%s1721_s4] sm:$0x3] }
  0x41   :  { %728 = vmatprep.subr.bf16.mxu1 %v1342_v57  ;;  %v1540_v57 = vsub.s32 1, %v172_v53  ;;  %v1597_v53 = vld [vmem:[%s1725_s8] sm:$0x3] }
  0x43   :  { %688 = vmatpush2.bf16.msra.mxu0 %v1341_v58  ;;  %v793_v58 = vrot.slane %v788_v54, %v1535_v55 }
  0x44   :  { %689 = vmatprep.subr.bf16.mxu0 %v1345_v59  ;;  %729 = vmatpush2.bf16.msra.mxu1 %v1344_v60  ;;  %v786_v59 = vld [vmem:[%s1718_s1] sm:$0xff] }
  0x45   :  { %730 = vmatprep.subr.bf16.mxu1 %v1348_v61  ;;  %v802_v60 = vld [vmem:[%s1723_s6] sm:$0x3]  ;;  %v174_v61 = vrot.slane %v169_v56, %v1535_v55 }
  0x46   :  { %v811_v6 = vrot.slane %v802_v60, %v1540_v57 }
  0x47   :  { %690 = vmatpush2.bf16.msra.mxu0 %v1347_v62  ;;  %v797_v62 = vrot.slane %v788_v54, %v1540_v57 }
  0x48   :  { %691 = vmatprep.subr.bf16.mxu0 %v1351_v63  ;;  %731 = vmatpush2.bf16.msra.mxu1 %v1350_v0  ;;  %v787_v63 = vld [vmem:[%s1718_s1 + $0x8] sm:$0xff]  ;;  %v178_v0 = vrot.slane %v169_v56, %v1540_v57 }
  0x49   :  { %732 = vmatprep.subr.bf16.mxu1 %v1354_v2  ;;  %v807_v2 = vrot.slane %v802_v60, %v1535_v55  ;;  %v1197_v60 = vld [vmem:[%s1726_s9] ss:$0 sm:$0xff] }
  0x4b   :  { %692 = vmatpush2.bf16.msra.mxu0 %v1353_v1  ;;  %v800_v1 = vmul.f32 %v793_v58, %v786_v59  ;;  %v862_v58 = vrot.slane %v1592_v52, %v1540_v57 }
  0x4c   :  { %743 = vmatprep.subr.bf16.mxu0 %v1359_v5  ;;  %733 = vmatpush2.bf16.msra.mxu1 %v1356_v3  ;;  %v822_v3 = vld [vmem:[%s1719_s2] sm:$0xff]  ;;  %v801_v5 = vmul.f32 %v797_v62, %v787_v63  ;;  %v876_v63 = vrot.slane %v1597_v53, %v1540_v57  ;;  %v916_v57 = vld [vmem:[%s1728_s11 + $0x70] sm:$0xff] }
  0x4d   :  { %1405 = vrcp.f32 %v822_v3 }
  0x4e   :  { %694 = vmatmul.mubr.bf16.vlgmr.msra.gmra.mxu0 %v67_v7 }
  0x4f   :  { %744 = vmatpush1.bf16.msra.mxu0 %v1357_v8  ;;  %735 = vmatmul.mubr.bf16.vlgmr.msra.gmra.mxu1 %v69_v9  ;;  %v814_v8 = vadd.f32 %v807_v2, %v800_v1 }
  0x50   :  { %745 = vmatprep.subr.bf16.mxu0 %v1362_v10  ;;  %775 = vmatprep.mubr.bf16.mxu0 %v72_v12  ;;  %v815_v10 = vadd.f32 %v811_v6, %v801_v5  ;;  %v917_v6 = vld [vmem:[%s1728_s11 + $0x78] sm:$0xff] }
  0x53   :  { %746 = vmatpush1.bf16.msra.mxu0 %v1360_v13 }
  0x54   :  { %747 = vmatprep.subr.bf16.mxu0 %v1365_v14  ;;  %v816_v14 = vmax.f32 %v814_v8, 0.0  ;;  %v932_v8 = vld [vmem:[%s1728_s11 + $0xf0] sm:$0xff] }
  0x57   :  { %748 = vmatpush1.bf16.msra.mxu0 %v1363_v15 }
  0x58   :  { %749 = vmatprep.subr.bf16.mxu0 %v1368_v16 }
  0x5b   :  { %750 = vmatpush1.bf16.msra.mxu0 %v1366_v17 }
  0x5c   :  { %751 = vmatprep.subr.bf16.mxu0 %v1371_v18  ;;  %v817_v18 = vmax.f32 %v815_v10, 0.0  ;;  %v915_v10 = vld [vmem:[%s1728_s11 + $0x68] sm:$0xff] }
  0x5f   :  { %752 = vmatpush1.bf16.msra.mxu0 %v1369_v19 }
  0x60   :  { %753 = vmatprep.subr.bf16.mxu0 %v1374_v20 }
  0x63   :  { %754 = vmatpush1.bf16.msra.mxu0 %v1372_v21 }
  0x64   :  { %755 = vmatprep.subr.bf16.mxu0 %v1377_v22 }
  0x67   :  { %756 = vmatpush1.bf16.msra.mxu0 %v1375_v23 }
  0x68   :  { %757 = vmatprep.subr.bf16.mxu0 %v1380_v24 }
  0x6b   :  { %758 = vmatpush1.bf16.msra.mxu0 %v1378_v25  ;;  %v1406_v25 = vpop.eup %1405 }
  0x6c   :  { %759 = vmatprep.subr.bf16.mxu0 %v1383_v26 }
  0x6f   :  { %760 = vmatpush2.bf16.msra.mxu0 %v1381_v27 }
  0x70   :  { %761 = vmatprep.subr.bf16.mxu0 %v1386_v28 }
  0x73   :  { %762 = vmatpush2.bf16.msra.mxu0 %v1384_v29 }
  0x74   :  { %763 = vmatprep.subr.bf16.mxu0 %v1389_v30  ;;  %v838_v30 = vmul.f32 %v1406_v25, %v1406_v25 }
  0x77   :  { %764 = vmatpush2.bf16.msra.mxu0 %v1387_v31 }
  0x78   :  { %765 = vmatprep.subr.bf16.mxu0 %v1392_v32  ;;  %v829_v32 = vsel %vm828_vm0, %v1406_v25, 0.0 }
  0x7b   :  { %766 = vmatpush2.bf16.msra.mxu0 %v1390_v33  ;;  %v839_v33 = vsel %vm828_vm0, %v838_v30, 0.0 }
  0x7c   :  { %767 = vmatprep.subr.bf16.mxu0 %v1395_v34  ;;  %v938_v34 = vld [vmem:[%s1729_s12 + $0x20] sm:$0xf] }
  0x7f   :  { %768 = vmatpush2.bf16.msra.mxu0 %v1393_v35  ;;  %v1434_v35 = vmov 0.0  }
  0x80   :  { %769 = vmatprep.subr.bf16.mxu0 %v1398_v36  ;;  %1243 = vmatprep.subr.mxu1 %v1434_v35  ;;  %v937_v36 = vld [vmem:[%s1729_s12 + $0x18] sm:$0xff] }
  0x81   :  { %1244 = vmatpush3.msk.msra.mxu1 %vm942_vm1, %v938_v34  ;;  %1253 = vmatprep.mubr.msk.f32.mxu1 %vm1435_vm2, %v1434_v35  ;;  %v905_v34 = vld [vmem:[%s1728_s11 + $0x18] sm:$0xff] }
  0x82   :  { %1245 = vmatprep.subr.mxu1 %v1434_v35 }
  0x83   :  { %770 = vmatpush2.bf16.msra.mxu0 %v1396_v37  ;;  %v936_v37 = vld [vmem:[%s1729_s12 + $0x10] sm:$0xff]  ;;  %1246 = vmatpush3.msra.mxu1 %v937_v36 }
  0x84   :  { %771 = vmatprep.subr.bf16.mxu0 %v1401_v38  ;;  %1247 = vmatprep.subr.mxu1 %v1434_v35  ;;  %v935_v38 = vld [vmem:[%s1729_s12 + $0x8] sm:$0xff]  ;;  %v920_v36 = vld [vmem:[%s1728_s11 + $0x90] sm:$0xff] }
  0x85   :  { %1248 = vmatpush3.msra.mxu1 %v936_v37  ;;  %v904_v37 = vld [vmem:[%s1728_s11 + $0x10] sm:$0xff] }
  0x86   :  { %1249 = vmatprep.subr.mxu1 %v1434_v35 }
  0x87   :  { %772 = vmatpush2.bf16.msra.mxu0 %v1399_v39  ;;  %v934_v39 = vld [vmem:[%s1729_s12] sm:$0xff]  ;;  %1250 = vmatpush3.msra.mxu1 %v935_v38  ;;  %v903_v38 = vld [vmem:[%s1728_s11 + $0x8] sm:$0xff] }
  0x88   :  { %773 = vmatprep.subr.bf16.mxu0 %v1404_v40  ;;  %v933_v40 = vld [vmem:[%s1728_s11 + $0xf8] sm:$0xff]  ;;  %1251 = vmatprep.subr.mxu1 %v1434_v35 }
  0x89   :  { %1252 = vmatpush3.msra.mxu1 %v934_v39 }
  0x8a   :  { %1208 = vmatprep.subr.mxu1 %v933_v40  ;;  %v918_v40 = vld [vmem:[%s1728_s11 + $0x80] sm:$0xff] }
  0x8b   :  { %774 = vmatpush2.bf16.msra.mxu0 %v1402_v41 }
  0x8e   :  { %776 = vmatmul.mubr.bf16.vlgmr.msra.gmra.mxu0 %v71_v43 }
 0x10e   :  { %v695_v44 = vpop.f32.mrf.mxu0 }
 0x10f   :  { %v736_v46 = vpop.f32.mrf.mxu1  ;;  %v696_v4 = vadd.f32 %v695_v44, %v174_v61 }
 0x110   :  { %v697_v45 = vpop.f32.mrf.mxu0 }
 0x111   :  { %v738_v48 = vpop.f32.mrf.mxu1  ;;  %v698_v7 = vadd.f32 %v697_v45, %v178_v0  ;;  %v737_v9 = vadd.f32 %v736_v46, %v696_v4  ;;  %v1198_v0 = vld [vmem:[%s1727_s10] ss:$0 sm:$0xff] }
 0x112   :  { %v699_v47 = vpop.f32.mrf.mxu0 }
 0x113   :  { %v740_v50 = vpop.f32.mrf.mxu1  ;;  %v739_v12 = vadd.f32 %v738_v48, %v698_v7 }
 0x114   :  { %v700_v49 = vpop.f32.mrf.mxu0 }
 0x115   :  { %v741_v51 = vpop.f32.mrf.mxu1 }
 0x14e   :  { %v777_v11 = vpop.f32.mrf.mxu0 }
 0x14f   :  { %v778_v13 = vadd.f32 %v777_v11, %v737_v9  ;;  %v931_v9 = vld [vmem:[%s1728_s11 + $0xe8] sm:$0xff]  ;;  %v930_v11 = vld [vmem:[%s1728_s11 + $0xe0] sm:$0xff] }
 0x150   :  { %v779_v15 = vpop.f32.mrf.mxu0 }
 0x151   :  { %v784_v16 = vmax.f32 %v778_v13, 0.0  ;;  %v780_v17 = vadd.f32 %v779_v15, %v739_v12  ;;  %v914_v12 = vld [vmem:[%s1728_s11 + $0x60] sm:$0xff]  ;;  %v929_v13 = vld [vmem:[%s1728_s11 + $0xd8] sm:$0xff]  ;;  %v928_v15 = vld [vmem:[%s1728_s11 + $0xd0] sm:$0xff] }
 0x152   :  { %v781_v19 = vpop.f32.mrf.mxu0 }
 0x153   :  { %v818_v20 = vadd.f32 %v816_v14, %v784_v16  ;;  %v785_v21 = vmax.f32 %v780_v17, 0.0  ;;  %v913_v14 = vld [vmem:[%s1728_s11 + $0x58] sm:$0xff]  ;;  %v912_v16 = vld [vmem:[%s1728_s11 + $0x50] sm:$0xff]  ;;  %v927_v17 = vld [vmem:[%s1728_s11 + $0xc8] sm:$0xff] }
 0x154   :  { %v782_v22 = vpop.f32.mrf.mxu0  ;;  %v926_v19 = vld [vmem:[%s1728_s11 + $0xc0] sm:$0xff] }
 0x155   :  { %v1560_v23 = vmul.f32 0.5, %v818_v20  ;;  %v819_v24 = vadd.f32 %v817_v18, %v785_v21  ;;  %v911_v18 = vld [vmem:[%s1728_s11 + $0x48] sm:$0xff]  ;;  %v910_v20 = vld [vmem:[%s1728_s11 + $0x40] sm:$0xff]  ;;  %v925_v21 = vld [vmem:[%s1728_s11 + $0xb8] sm:$0xff] }
 0x156   :  { %v909_v22 = vld [vmem:[%s1728_s11 + $0x38] sm:$0xff] }
 0x157   :  { %v821_v26 = vmul.f32 0.5, %v819_v24  ;;  %v833_v28 = vmul.f32 %v1560_v23, %v1560_v23  ;;  %v924_v24 = vld [vmem:[%s1728_s11 + $0xb0] sm:$0xff] }
 0x159   :  { %v825_v27 = vadd.f32 %v821_v26, %v1560_v23  ;;  %v834_v29 = vmul.f32 %v821_v26, %v821_v26 }
 0x15b   :  { %826 = vadd.xlane.f32.xlu0 %v825_v27  ;;  %v835_v31 = vadd.f32 %v834_v29, %v833_v28  ;;  %v923_v27 = vld [vmem:[%s1728_s11 + $0xa8] sm:$0xff]  ;;  %v858_v28 = vrot.slane %v1592_v52, %v1535_v55 }
 0x15c   :  { %v907_v29 = vld [vmem:[%s1728_s11 + $0x28] sm:$0xff] }
 0x15d   :  { %836 = vadd.xlane.f32.xlu1 %v835_v31  ;;  %v906_v31 = vld [vmem:[%s1728_s11 + $0x20] sm:$0xff] }
 0x15f   :  { %830 = vadd.xlane.f32.xlu0 %v829_v32  ;;  %v921_v32 = vld [vmem:[%s1728_s11 + $0x98] sm:$0xff] }
 0x161   :  { %840 = vadd.xlane.f32.xlu1 %v839_v33  ;;  %v872_v33 = vrot.slane %v1597_v53, %v1535_v55  ;;  %v919_v55 = vld [vmem:[%s1728_s11 + $0x88] sm:$0xff] }
 0x1e4   :  { %v827_v41 = vpop.xlane.xlu0 %826 }
 0x1e6   :  { %v837_v42 = vpop.xlane.xlu1 %836 }
 0x1e8   :  { %v831_v43 = vpop.xlane.xlu0 %830 }
 0x1e9   :  { %v832_v44 = vadd.f32 %v831_v43, %v827_v41  ;;  %v902_v41 = vld [vmem:[%s1728_s11] sm:$0xff] }
 0x1ea   :  { %v841_v45 = vpop.xlane.xlu1 %840 }
 0x1eb   :  { %v1585_v46 = vmul.f32 0.0034246575, %v832_v44  ;;  %v842_v47 = vadd.f32 %v841_v45, %v837_v42 }
 0x1ed   :  { %v844_v48 = vmul.f32 0.0034246575, %v842_v47  ;;  %v845_v49 = vmul.f32 %v1585_v46, %v1585_v46  ;;  %v850_v54 = vsub.f32 %v821_v26, %v1585_v46  ;;  %v883_v56 = vsub.f32 %v1406_v25, %v1585_v46  ;;  %v908_v26 = vld [vmem:[%s1728_s11 + $0x30] sm:$0xff] }
 0x1ee   :  { %v849_v25 = vsub.f32 %v1560_v23, %v1585_v46  ;;  %v922_v23 = vld [vmem:[%s1728_s11 + $0xa0] sm:$0xff] }
 0x1ef   :  { %v846_v50 = vsub.f32 %v844_v48, %v845_v49  ;;  %v1201_v48 = vld [vmem:[%s1730_s13] ss:$0 sm:$0xff] }
 0x1f1   :  { %v847_v51 = vadd.f32 1e-05, %v846_v50 }
 0x1f3   :  { %1407 = vrsqrt.f32 %v847_v51 }
 0x200   :  { %v1408_v59 = vpop.eup %1407 }
 0x201   :  { %v884_v61 = vmul.f32 %v1408_v59, %v883_v56  ;;  %v852_v62 = vmul.f32 %v1408_v59, %v850_v54  ;;  %v851_v30 = vmul.f32 %v1408_v59, %v849_v25 }
 0x203   :  { %v892_v1 = vmul.f32 %v1197_v60, %v884_v61  ;;  %v866_v2 = vmul.f32 %v862_v58, %v852_v62  ;;  %v865_v35 = vmul.f32 %v858_v28, %v851_v30 }
 0x205   :  { %v900_v3 = vadd.f32 %v1198_v0, %v892_v1  ;;  %v880_v4 = vadd.f32 %v876_v63, %v866_v2  ;;  %v879_v39 = vadd.f32 %v872_v33, %v865_v35 }
 0x207   :  { %v901_v5 = vmax.f32 %v900_v3, 0.0  ;;  %v882_v7 = vmax.f32 %v880_v4, 0.0  ;;  %v881_v42 = vmax.f32 %v879_v39, 0.0 }
 0x209   :  { %1254 = vmatmul.mubr.msk.f32.vlgmr.msra.gmra.mxu1 %vm828_vm0, %v901_v5 }
 0x20a   :  { %1209 = vmatpush3.msra.mxu1 %v917_v6  ;;  %1080 = vmatprep.mubr.f32.mxu1 %v882_v7 }
 0x20b   :  { %1210 = vmatprep.subr.mxu1 %v932_v8 }
 0x20c   :  { %1211 = vmatpush3.msra.mxu1 %v916_v57 }
 0x20d   :  { %1212 = vmatprep.subr.mxu1 %v931_v9 }
 0x20e   :  { %1213 = vmatpush3.msra.mxu1 %v915_v10 }
 0x20f   :  { %1214 = vmatprep.subr.mxu1 %v930_v11 }
 0x210   :  { %1215 = vmatpush3.msra.mxu1 %v914_v12 }
 0x211   :  { %1216 = vmatprep.subr.mxu1 %v929_v13 }
 0x212   :  { %1217 = vmatpush3.msra.mxu1 %v913_v14 }
 0x213   :  { %1218 = vmatprep.subr.mxu1 %v928_v15 }
 0x214   :  { %1219 = vmatpush3.msra.mxu1 %v912_v16 }
 0x215   :  { %1220 = vmatprep.subr.mxu1 %v927_v17 }
 0x216   :  { %1221 = vmatpush3.msra.mxu1 %v911_v18 }
 0x217   :  { %1222 = vmatprep.subr.mxu1 %v926_v19 }
 0x218   :  { %1223 = vmatpush3.msra.mxu1 %v910_v20 }
 0x219   :  { %1224 = vmatprep.subr.mxu1 %v925_v21 }
 0x21a   :  { %1225 = vmatpush3.msra.mxu1 %v909_v22 }
 0x21b   :  { %1226 = vmatprep.subr.mxu1 %v924_v24 }
 0x21c   :  { %1227 = vmatpush3.msra.mxu1 %v908_v26 }
 0x21d   :  { %1228 = vmatprep.subr.mxu1 %v923_v27 }
 0x21e   :  { %1229 = vmatpush3.msra.mxu1 %v907_v29 }
 0x21f   :  { %1230 = vmatprep.subr.mxu1 %v922_v23 }
 0x220   :  { %1231 = vmatpush3.msra.mxu1 %v906_v31 }
 0x221   :  { %1232 = vmatprep.subr.mxu1 %v921_v32 }
 0x222   :  { %1233 = vmatpush3.msra.mxu1 %v905_v34 }
 0x223   :  { %1234 = vmatprep.subr.mxu1 %v920_v36 }
 0x224   :  { %1235 = vmatpush3.msra.mxu1 %v904_v37 }
 0x225   :  { %1236 = vmatprep.subr.mxu1 %v919_v55 }
 0x226   :  { %1237 = vmatpush3.msra.mxu1 %v903_v38 }
 0x227   :  { %1238 = vmatprep.subr.mxu1 %v918_v40 }
 0x228   :  { %1239 = vmatpush3.msra.mxu1 %v902_v41 }
 0x229   :  { %1081 = vmatmul.mubr.f32.vlgmr.msra.gmra.mxu1 %v881_v42 }
 0x2c9   :  { %v1012_v43 = vpop.f32.mrf.mxu1 }
 0x2cb   :  { %v1255_v44 = vpop.f32.mrf.mxu1 }
 0x2e9   :  { %v1240_v45 = vpop.f32.mrf.mxu1 }
 0x2eb   :  { %v1241_v46 = vpop.f32.mrf.mxu1 }
 0x2ec   :  { %v1242_v47 = vadd.f32 %v1241_v46, %v1240_v45 }
 0x2ee   :  { %v1083_v49 = vadd.f32 %v1242_v47, %v1012_v43 }
 0x2f0   :  { %v1093_v50 = vadd.f32 %v1201_v48, %v1083_v49 }
 0x2f2   :  { %1095 = vst.msk [vmem:[%s1731_s14] sm:$0xff] %vm1094_vm3, %v1093_v50 }
 0x2f3   :  { %1100 = vsyncpa [#allocation3], 1 }

</bundles_post_ra>
